<compile_context>
chip_gen: v7x
topology: tpu7x:2x2x1
jax: 0.10.0
libtpu: 0.0.40
codegen_flags: <defaults>
</compile_context>

<pallas_src>
import functools

import jax
import jax.numpy as jnp
from jax.experimental import pallas as pl
from jax.experimental.pallas import tpu as pltpu


# ---------------------------------------------------------------------------
# Generation-aware budgets
# ---------------------------------------------------------------------------
def _round_up(x: int, m: int) -> int:
    return (x + m - 1) // m * m


def _cdiv(a: int, b: int) -> int:
    return (a + b - 1) // b


def _vmem_cap_bytes() -> int:
    """~75% of this generation's physical VMEM (≈96 MiB v5e/v6e, ≈48 MiB v7x)."""
    phys = 64 * 1024 * 1024  # conservative fallback (v7x per-TensorCore VMEM)
    try:
        info_phys = int(pltpu.get_tpu_info().vmem_capacity_bytes)
        if info_phys > 0:
            phys = info_phys
    except Exception:
        pass
    return (phys * 3) // 4


def _vmem_limit(needed_bytes: int, cap: int) -> int:
    floor = min(32 * 1024 * 1024, cap)
    return int(min(cap, max(floor, needed_bytes)))


# ---------------------------------------------------------------------------
# Single-pass kernel: each grid step holds `rows` full planes (one per row).
# ---------------------------------------------------------------------------
def _normalize_rows_kernel(x_ref, o_ref):
    x = x_ref[...]                                    # native dtype (no f32 tile upcast)
    m = jnp.max(x, axis=-1, keepdims=True)            # per-plane max (XLU reduce), exact
    m = m.astype(jnp.float32)
    m = jnp.where(m == 0.0, 1.0, m)                   # max == 0 -> 1
    inv = (1.0 / m).astype(x.dtype)                   # one reciprocal per plane, (rows,1)
    o_ref[...] = (x * inv).astype(o_ref.dtype)        # broadcast multiply, not divide


def _normalize_single_pass(x2, rows, vmem_cap, donate_input):
    p, l = x2.shape
    itemsize = jnp.dtype(x2.dtype).itemsize
    block_bytes = rows * l * itemsize
    spec = pl.BlockSpec((rows, l), lambda i: (i, 0))
    return pl.pallas_call(
        _normalize_rows_kernel,
        out_shape=jax.ShapeDtypeStruct((p, l), x2.dtype),
        grid_spec=pltpu.PrefetchScalarGridSpec(
            num_scalar_prefetch=0,
            grid=(_cdiv(p, rows),),
            in_specs=[spec],
            out_specs=spec,
        ),
        input_output_aliases={0: 0} if donate_input else {},
        compiler_params=pltpu.CompilerParams(
            dimension_semantics=("parallel",),
            # in (2 bufs) + out (2 bufs) + headroom
            vmem_limit_bytes=_vmem_limit(4 * block_bytes + (4 << 20), vmem_cap),
        ),
    )(x2)


# ---------------------------------------------------------------------------
# Two-pass tiled variant for large planes (VMEM-aware, 128-aligned lane tiles).
# ---------------------------------------------------------------------------
def _plane_max_kernel(x_ref, inv_ref, *, l_total, tile_l, needs_mask):
    j = pl.program_id(1)
    last_j = pl.num_programs(1) - 1

    @pl.when(j == 0)
    def _():
        inv_ref[...] = jnp.full(inv_ref.shape, -jnp.inf, dtype=inv_ref.dtype)

    if needs_mask:
        # Lane padding only exists on the last tile of the l axis; gate the
        # iota/compare/where mask there so every other tile is a plain reduce.
        @pl.when(j == last_j)
        def _():
            col = j * tile_l + jax.lax.broadcasted_iota(jnp.int32, x_ref.shape, 1)
            x = jnp.where(col < l_total, x_ref[...].astype(jnp.float32), -jnp.inf)
            inv_ref[...] = jnp.maximum(inv_ref[...],
                                       jnp.max(x, axis=-1, keepdims=True))

        @pl.when(j != last_j)
        def _():
            m = jnp.max(x_ref[...], axis=-1, keepdims=True).astype(jnp.float32)
            inv_ref[...] = jnp.maximum(inv_ref[...], m)
    else:
        m = jnp.max(x_ref[...], axis=-1, keepdims=True).astype(jnp.float32)
        inv_ref[...] = jnp.maximum(inv_ref[...], m)

    @pl.when(j == last_j)
    def _():
        m = inv_ref[...]
        m = jnp.where(m == 0.0, 1.0, m)
        inv_ref[...] = 1.0 / m                        # finalize to 1 / max


def _scale_kernel(x_ref, inv_ref, o_ref):
    x = x_ref[...]                                    # native dtype
    inv = inv_ref[...].astype(x.dtype)                # (rows, 1) broadcast scale
    o_ref[...] = (x * inv).astype(o_ref.dtype)


def _normalize_two_pass(x2, max_block_bytes, vmem_cap, donate_input):
    p, l = x2.shape
    itemsize = jnp.dtype(x2.dtype).itemsize
    # dtype-aware row count: bf16/fp8 pack more sublanes per vreg.
    rows = 16 if itemsize < 4 else 8
    rows = min(rows, _round_up(p, 8))

    # Pass 2 holds x-in + out (double-buffered) plus a tiny inv block:
    # keep ~5 * block_bytes under the per-generation VMEM cap; respect an
    # explicit caller budget when given (used by tests to force small tiles).
    gen_tile_cap = max((vmem_cap - (4 << 20)) // 5, rows * 128 * itemsize)
    tile_budget = min(max_block_bytes, gen_tile_cap)
    tile_l = max((tile_budget // (rows * itemsize)) // 128 * 128, 128)
    tile_l = min(tile_l, _round_up(l, 128))
    block_bytes = rows * tile_l * itemsize
    needs_mask = (l % tile_l) != 0

    grid = (_cdiv(p, rows), _cdiv(l, tile_l))
    # TODO(synk): sweep pipeline_mode=pl.Buffered(3) on the pass-1 x input for v7x.
    x_spec = pl.BlockSpec((rows, tile_l), lambda i, j: (i, j))
    inv_spec = pl.BlockSpec((rows, 1), lambda i, j: (i, 0))

    # Pass 1: per-plane max accumulated in a resident (rows, 1) output block.
    inv = pl.pallas_call(
        functools.partial(_plane_max_kernel, l_total=l, tile_l=tile_l,
                          needs_mask=needs_mask),
        out_shape=jax.ShapeDtypeStruct((p, 1), jnp.float32),
        grid_spec=pltpu.PrefetchScalarGridSpec(
            num_scalar_prefetch=0,
            grid=grid,
            in_specs=[x_spec],
            out_specs=inv_spec,
        ),
        compiler_params=pltpu.CompilerParams(
            dimension_semantics=("parallel", "arbitrary"),
            vmem_limit_bytes=_vmem_limit(3 * block_bytes + (4 << 20), vmem_cap),
        ),
    )(x2)

    # Pass 2: tile-by-tile broadcast multiply by the per-plane reciprocal.
    out = pl.pallas_call(
        _scale_kernel,
        out_shape=jax.ShapeDtypeStruct((p, l), x2.dtype),
        grid_spec=pltpu.PrefetchScalarGridSpec(
            num_scalar_prefetch=0,
            grid=grid,
            in_specs=[x_spec, inv_spec],
            out_specs=x_spec,
        ),
        input_output_aliases={0: 0} if donate_input else {},
        compiler_params=pltpu.CompilerParams(
            dimension_semantics=("parallel", "parallel"),
            vmem_limit_bytes=_vmem_limit(5 * block_bytes + (4 << 20), vmem_cap),
        ),
    )(x2, inv)
    return out


# ---------------------------------------------------------------------------
# Wrapper
# ---------------------------------------------------------------------------
def _single_pass_rows(p, row_bytes, budget, *, min_grid_steps=4):
    """Planes (rows) per block for the single-pass kernel, or None if a single
    plane-row already exceeds the per-block VMEM budget.

    Block row counts must be a multiple of 8 (sublane constraint) or equal the
    full row extent p.  Padded rows in the last block read garbage but each
    row's result depends only on its own row and padded writes are clipped, so
    this is safe (do not add cross-row reductions without revisiting this).
    """
    if p <= 8:
        return p if p * row_bytes <= budget else None
    if row_bytes > budget:
        return None
    max_rows = (budget // row_bytes) // 8 * 8
    if max_rows < 8:
        return None
    # Aim for >= min_grid_steps grid iterations so the BlockSpec pipeline can
    # overlap DMA-in / compute / DMA-out (and v7x's two TensorCores both get
    # work), while keeping blocks >= ~2 MiB for long DMA bursts.
    rows_for_grid = _round_up(_cdiv(p, min_grid_steps), 8)
    rows_for_2mib = _round_up(_cdiv(2 << 20, row_bytes), 8)
    rows = max(min(rows_for_grid, max_rows), min(rows_for_2mib, max_rows), 8)
    rows = min(rows, _round_up(p, 8))
    return int(rows)


def normalize_spec(spectrogram: jax.Array, *, max_block_bytes: int | None = None,
                   donate_input: bool = False):
    """(N, C, bins, frames) -> spectrogram / per-(N, C) max (max==0 treated as 1)."""
    n, c, nb_bins, nb_frames = spectrogram.shape
    p = n * c
    l = nb_bins * nb_frames
    x2 = spectrogram.reshape(p, l)            # lane-dense slab: one plane per row
    row_bytes = l * jnp.dtype(spectrogram.dtype).itemsize

    vmem_cap = _vmem_cap_bytes()
    if max_block_bytes is None:
        # 4 blocks (double-buffered in + out) plus headroom must fit in VMEM:
        # ~23 MiB blocks on v5e/v6e, ~11 MiB on v7x.
        max_block_bytes = max((vmem_cap - (4 << 20)) // 4, 2 << 20)

    rows = _single_pass_rows(p, row_bytes, max_block_bytes)
    if rows is not None:
        out2 = _normalize_single_pass(x2, rows, vmem_cap, donate_input)
    else:
        out2 = _normalize_two_pass(x2, max_block_bytes, vmem_cap, donate_input)
    return out2.reshape(spectrogram.shape)


def _reference(spectrogram: jax.Array) -> jax.Array:
    # Pure-JAX reference mirroring the PyTorch forward.
    max_values = jnp.max(spectrogram, axis=2, keepdims=True)
    max_values = jnp.max(max_values, axis=3, keepdims=True)
    max_values = jnp.where(max_values == 0, jnp.ones_like(max_values), max_values)
    return spectrogram / max_values


if __name__ == "__main__":
    key = jax.random.PRNGKey(0)
    # (nb_samples, nb_channels, nb_bins, nb_frames)
    x = jax.random.uniform(key, (2, 4, 16, 16), dtype=jnp.float32)
    # Make one (sample, channel) plane all-zero to exercise the max==0 -> 1 branch.
    x = x.at[1, 2].set(0.0)
    ref = _reference(x)

    # Fast path: single-pass, whole planes per block.
    out = jax.block_until_ready(normalize_spec(x))
    assert out.shape == x.shape and out.dtype == x.dtype
    assert jnp.allclose(out, ref, atol=1e-6, rtol=1e-6)

    # Force the tiled two-pass (large-plane) path on the same data by passing a
    # tiny per-block budget: 256 lanes -> two 128-wide lane tiles per plane.
    out2 = jax.block_until_ready(normalize_spec(x, max_block_bytes=512))
    assert jnp.allclose(out2, ref, atol=1e-6, rtol=1e-6)

    # Ragged lane count (10*13 = 130) exercises the last-tile padding mask in
    # the two-pass path and the full-lane (non-multiple-of-128) single pass.
    x3 = jax.random.normal(jax.random.PRNGKey(1), (2, 4, 10, 13), dtype=jnp.float32)
    ref3 = _reference(x3)
    out3a = jax.block_until_ready(normalize_spec(x3))
    out3b = jax.block_until_ready(normalize_spec(x3, max_block_bytes=512))
    assert jnp.allclose(out3a, ref3, atol=1e-6, rtol=1e-6)
    assert jnp.allclose(out3b, ref3, atol=1e-6, rtol=1e-6)

    # bf16: native-dtype max/multiply path (looser tolerance: mult-by-recip in
    # bf16 vs bf16 divide differs by ~1 ulp).
    xb = x.astype(jnp.bfloat16)
    refb = _reference(xb).astype(jnp.float32)
    outb = jax.block_until_ready(normalize_spec(xb)).astype(jnp.float32)
    assert jnp.allclose(outb, refb, atol=2e-2, rtol=2e-2)

    print("KERNEL_OK")
</pallas_src>

<mosaic_0001>
module attributes {stable_mosaic.version = 11 : i64} {
  func.func @_normalize_rows_kernel(%arg0: i32, %arg1: memref<8x256xf32, #tpu.memory_space<vmem>>, %arg2: memref<8x256xf32, #tpu.memory_space<vmem>>) attributes {dimension_semantics = [#tpu.dimension_semantics<parallel>], iteration_bounds = array<i64: 1>, scalar_prefetch = 0 : i64, scratch_operands = 0 : i64, tpu.core_type = #tpu.core_type<tc>, window_params = [{transform_indices = @transform_0, window_bounds = array<i64: 8, 256>}, {transform_indices = @transform_1, window_bounds = array<i64: 8, 256>}]} {
    %c0 = arith.constant 0 : index
    %c0_0 = arith.constant 0 : index
    %0 = vector.load %arg1[%c0, %c0_0] : memref<8x256xf32, #tpu.memory_space<vmem>>, vector<8x256xf32>
    %cst = arith.constant dense<0xFF800000> : vector<8xf32>
    %1 = vector.multi_reduction <maximumf>, %0, %cst [1] : vector<8x256xf32> to vector<8xf32>
    %2 = vector.shape_cast %1 : vector<8xf32> to vector<8x1xf32>
    %cst_1 = arith.constant 0.000000e+00 : f32
    %3 = vector.broadcast %cst_1 : f32 to vector<8x1xf32>
    %4 = arith.cmpf oeq, %2, %3 : vector<8x1xf32>
    %cst_2 = arith.constant 1.000000e+00 : f32
    %5 = vector.broadcast %cst_2 : f32 to vector<8x1xf32>
    %6 = arith.select %4, %5, %2 : vector<8x1xi1>, vector<8x1xf32>
    %cst_3 = arith.constant 1.000000e+00 : f32
    %7 = vector.broadcast %cst_3 : f32 to vector<8x1xf32>
    %8 = arith.divf %7, %6 : vector<8x1xf32>
    %9 = vector.broadcast %8 : vector<8x1xf32> to vector<8x256xf32>
    %10 = arith.mulf %0, %9 : vector<8x256xf32>
    %c0_4 = arith.constant 0 : index
    %c0_5 = arith.constant 0 : index
    %11 = vector.load %arg2[%c0_4, %c0_5] : memref<8x256xf32, #tpu.memory_space<vmem>>, vector<8x256xf32>
    tpu.vector_store %arg2[%c0_4, %c0_5], %10 {strides = array<i32>} : memref<8x256xf32, #tpu.memory_space<vmem>>, vector<8x256xf32>,
    return
  }
  func.func @transform_0(%arg0: i32) -> (i32, i32) {
    %c0_i32 = arith.constant 0 : i32
    %c0_i32_0 = arith.constant 0 : i32
    return %arg0, %c0_i32 : i32, i32
  }
  func.func @transform_1(%arg0: i32) -> (i32, i32) {
    %c0_i32 = arith.constant 0 : i32
    %c0_i32_0 = arith.constant 0 : i32
    return %arg0, %c0_i32 : i32, i32
  }
}

</mosaic_0001>

<bundles_post_ra>
// kernel: tpu_custom_call.1
= control target key start
LH: loop header
LB: loop body
LE: loop exit
PB: predicated region body
PF: predicated region fallthrough
CT: control target
= control target key end

     0   :  { %6 = vsyncpa [#allocation3], 0  ;;  %s137_s0 = inlined_call_operand.hbm [shape: f32[8,256], index: 0, kind: input, shape index: {}]   ;;  %s138_s1 = inlined_call_operand.hbm [shape: f32[8,256], index: 1, kind: output, shape index: {}]  }
   0x1   :  { %7 = vsyncpa [#allocation4], 0  ;;  %s101_s6 = smov [#allocation2]   ;;  %s53_s10 = scalar_lea.hbm %s137_s0, 256 }
   0x2   :  { %s14_s7 = sshll.u32 %s101_s6, 4  ;;  %p54_p0 = scmp.ne.s32.totalorder %s137_s0, %s53_s10  ;;  %s15_s7 = int_to_ptr.vmem [resolvable:$true] %s14_s7 }
   0x3   :  { %p57_p1 = scmp.lt.u32.totalorder %s53_s10, %s137_s0 }
   0x5   :  { %p59_p2 = pnand %p57_p1, %p54_p0 }
   0x7   :  { %62 = shalt.err (!%p59_p2)
}
   0x8   :  { %s63_s15 = scalar_lea.vmem %s15_s7, 256  ;;  %p68_p4 = scmp.lt.s32.totalorder %s15_s7, %s15_s7 }
   0x9   :  { %p64_p3 = scmp.ne.s32.totalorder %s15_s7, %s63_s15  ;;  %p69_p5 = scmp.lt.s32.totalorder %s63_s15, %s63_s15 }
   0xb   :  { %p70_p6 = por %p69_p5, %p68_p4 }
   0xd   :  { %p71_p7 = pnand %p70_p6, %p64_p3 }
   0xf   :  { %74 = shalt.err (!%p71_p7)
}
  0x10   :  { %17 = dma.hbm_to_vmem [thread:$0]  %s137_s0, 256, %s15_s7, [#allocation3]  }
  0x11   :  { %97 = dma.done.wait [#allocation3], 256  }
  0x12   :  { %98 = vsyncadd [#allocation3], 4294967040  ;;  %v21_v0 = vld [vmem:[#allocation2] sm:$0xff]  ;;  %v22_v1 = vld [vmem:[#allocation2 + $0x8] sm:$0xff]  ;;  %s102_s18 = smov [#allocation5]  }
  0x13   :  { %v23_v2 = vmax.f32 %v21_v0, %v22_v1  ;;  %s40_s19 = sshll.u32 %s102_s18, 4  ;;  %s41_s19 = int_to_ptr.vmem [resolvable:$true] %s40_s19 }
  0x14   :  { %s75_s20 = scalar_lea.vmem %s41_s19, 256  ;;  %p80_p9 = scmp.lt.s32.totalorder %s41_s19, %s41_s19 }
  0x15   :  { %24 = vmax.xlane.f32.xlu0 %v23_v2  ;;  %p76_p8 = scmp.ne.s32.totalorder %s41_s19, %s75_s20  ;;  %p81_p10 = scmp.lt.s32.totalorder %s75_s20, %s75_s20 }
  0x17   :  { %p82_p11 = por %p81_p10, %p80_p9 }
  0x19   :  { %p83_p12 = pnand %p82_p11, %p76_p8 }
  0xa2   :  { %v25_v3 = vpop.xlane.xlu0 %24 }
  0xa3   :  { %vm26_vm0 = vcmp.eq.f32.partialorder %v25_v3, 0.0 }
  0xa4   :  { %v27_v4 = vsel %vm26_vm0, 1.0, %v25_v3 }
  0xa5   :  { %51 = vrcp.f32 %v27_v4 }
  0xaf   :  { %v52_v5 = vpop.eup %51 }
  0xb0   :  { %v30_v6 = vmul.f32 %v52_v5, %v21_v0  ;;  %v31_v7 = vmul.f32 %v52_v5, %v22_v1 }
  0xb2   :  { %32 = vst [vmem:[#allocation5] sm:$0xff] %v30_v6  ;;  %33 = vst [vmem:[#allocation5 + $0x8] sm:$0xff] %v31_v7 }
  0xb3   :  { %86 = shalt.err (!%p83_p12)
}
  0xb4   :  { %s87_s22 = scalar_lea.hbm %s138_s1, 256 }
  0xb5   :  { %p88_p13 = scmp.ne.s32.totalorder %s138_s1, %s87_s22  ;;  %p91_p0 = scmp.lt.u32.totalorder %s87_s22, %s138_s1 }
  0xb7   :  { %p93_p1 = pnand %p91_p0, %p88_p13 }
  0xb9   :  { %96 = shalt.err (!%p93_p1)
}
  0xba   :  { %43 = dma.vmem_to_hbm [thread:$0]  %s41_s19, 256, %s138_s1, [#allocation4]  }
  0xbb   :  { %99 = dma.done.wait [#allocation4], 256  }
  0xbc   :  { %100 = vsyncadd [#allocation4], 4294967040 }
  0xbd   :  { %47 = vsyncpa [#allocation3], 1 }
  0xbe   :  { %48 = vsyncpa [#allocation4], 1 }

</bundles_post_ra>
